<compile_context>
chip_gen: v6e
topology: v6e:2x2x1
jax: 0.10.0
libtpu: 0.0.40
codegen_flags: <defaults>
</compile_context>

<pallas_src>
import functools

import jax
import jax.numpy as jnp
import numpy as np
from jax.experimental import pallas as pl
from jax.experimental.pallas import tpu as pltpu

LANE = 128
SUBLANE = 8


def _round_up(x, m):
    return ((x + m - 1) // m) * m


def actor_kernel(x_ref, w1_ref, b1_ref, w2_ref, b2_ref, w3t_ref, b3t_ref,
                 out_ref, *, action_dim):
    x = x_ref[...]                                               # [TB, K]
    # Layer 1 + ReLU
    h1 = jnp.maximum(
        jnp.dot(x, w1_ref[...], preferred_element_type=jnp.float32) + b1_ref[...],
        0.0)                                                     # [TB, H]
    # Layer 2 + ReLU
    h2 = jnp.maximum(
        jnp.dot(h1, w2_ref[...], preferred_element_type=jnp.float32) + b2_ref[...],
        0.0)                                                     # [TB, H]
    # Output head computed directly in transposed (batch-on-lane) layout:
    #   raw_t[r, b] = sum_h w3t[r, h] * h2[b, h]   (w3t is [8, H], PyTorch [out, in])
    raw_t = jax.lax.dot_general(
        w3t_ref[...], h2,
        dimension_numbers=(((1,), (1,)), ((), ())),
        preferred_element_type=jnp.float32) + b3t_ref[...]       # [8, TB]

    # Rows [0:A] = mean, rows [A:2A] = std; rows 2A..7 are dead padding (exp(0)=1).
    row = jax.lax.broadcasted_iota(jnp.int32, raw_t.shape, 0)
    mean_t = jnp.clip(raw_t, -100.0, 100.0)
    std_t = jnp.clip(jnp.exp(jnp.clip(raw_t, -20.0, 2.0)), 0.01, 100.0)
    out_ref[...] = jnp.where(row < action_dim, mean_t, std_t)


def _choose_batch_tiling(batch, block_b):
    """Returns (TB, n_tiles). TB is a multiple of 128 when multi-tiled (lane-dense
    stores); for small batches a single full-array tile is used (no divisibility
    constraint when block dims equal array dims)."""
    block_b = max(int(block_b), LANE)
    if batch < 2 * LANE:
        return batch, 1
    # >= 2 steps so the "parallel" batch axis can shard across both v7x TensorCores.
    n_tiles = max(pl.cdiv(batch, block_b), 2)
    tb = _round_up(pl.cdiv(batch, n_tiles), LANE)
    return tb, pl.cdiv(batch, tb)


def actor_forward(state, params, action_dim, *, block_b=4096):
    """state: [B, state_dim] float32.  Returns (mean, std), each [B, action_dim]."""
    w1, b1, w2, b2, w3t, b3t = params
    B, K = state.shape
    H = w1.shape[1]
    R = w3t.shape[0]          # padded output rows (>= 2*action_dim, multiple of 8)
    A = action_dim

    TB, n_tiles = _choose_batch_tiling(B, block_b)

    def resident(arr):
        # Constant block index -> fetched once, stays VMEM-resident across grid steps.
        return pl.BlockSpec(arr.shape, lambda i: (0, 0))

    in_specs = [
        pl.BlockSpec((TB, K), lambda i: (i, 0)),   # state tile (pipelined over batch)
        resident(w1), resident(b1),
        resident(w2), resident(b2),
        resident(w3t), resident(b3t),
    ]
    out_specs = pl.BlockSpec((R, TB), lambda i: (0, i))

    param_bytes = sum(int(np.prod(p.shape)) * 4 for p in params)
    cost = pl.CostEstimate(
        flops=2 * B * (K * H + H * H + H * R),
        transcendentals=B * R,
        bytes_accessed=4 * (B * K + R * B) + param_bytes,
    )

    out = pl.pallas_call(
        functools.partial(actor_kernel, action_dim=A),
        out_shape=jax.ShapeDtypeStruct((R, B), jnp.float32),
        grid=(n_tiles,),
        in_specs=in_specs,
        out_specs=out_specs,
        compiler_params=pltpu.CompilerParams(
            dimension_semantics=("parallel",)),
        cost_estimate=cost,
    )(state, w1, b1, w2, b2, w3t, b3t)

    mean = jnp.transpose(out[:A, :])         # [B, A]
    std = jnp.transpose(out[A:2 * A, :])     # [B, A]
    return mean, std


def xavier_uniform(key, fan_in, fan_out, shape):
    limit = float(np.sqrt(6.0 / (fan_in + fan_out)))
    return jax.random.uniform(key, shape, jnp.float32, -limit, limit)


def init_actor_params(key, state_dim, action_dim, hidden_dim):
    """w1/w2 stored as [in, out] (xavier is symmetric in fan_in/fan_out, so the
    init distribution matches PyTorch); the head w3t is stored in PyTorch layout
    [out, in], zero-padded to 8 output rows (sublane multiple)."""
    k1, k2, k3 = jax.random.split(key, 3)
    R = _round_up(2 * action_dim, SUBLANE)

    w1 = xavier_uniform(k1, state_dim, hidden_dim, (state_dim, hidden_dim))
    b1 = jnp.full((1, hidden_dim), 0.01, jnp.float32)

    w2 = xavier_uniform(k2, hidden_dim, hidden_dim, (hidden_dim, hidden_dim))
    b2 = jnp.full((1, hidden_dim), 0.01, jnp.float32)

    w3t = jnp.zeros((R, hidden_dim), jnp.float32)
    w3t = w3t.at[:2 * action_dim, :].set(
        xavier_uniform(k3, hidden_dim, 2 * action_dim, (2 * action_dim, hidden_dim)))
    b3t = jnp.zeros((R, 1), jnp.float32)
    b3t = b3t.at[:2 * action_dim, :].set(0.01)

    return (w1, b1, w2, b2, w3t, b3t)


def actor_forward_ref(state, params, action_dim):
    w1, b1, w2, b2, w3t, b3t = params
    A = action_dim
    h1 = jnp.maximum(state @ w1 + b1, 0.0)
    h2 = jnp.maximum(h1 @ w2 + b2, 0.0)
    out = h2 @ w3t[:2 * A, :].T + b3t[:2 * A, 0]
    mean = jnp.clip(out[:, :A], -100.0, 100.0)
    std = jnp.clip(jnp.exp(jnp.clip(out[:, A:2 * A], -20.0, 2.0)), 0.01, 100.0)
    return mean, std


if __name__ == "__main__":
    # Pendulum-v1: state_dim=3, action_dim=1, action_range=2.0
    STATE_DIM, ACTION_DIM, HIDDEN_DIM = 3, 1, 32
    BATCH = 2

    key = jax.random.PRNGKey(0)
    k_params, k_state, k_state2 = jax.random.split(key, 3)
    params = init_actor_params(k_params, STATE_DIM, ACTION_DIM, HIDDEN_DIM)

    # Small (single-tile) case.
    state = jax.random.normal(k_state, (BATCH, STATE_DIM), jnp.float32)
    mean, std = actor_forward(state, params, ACTION_DIM)
    jax.block_until_ready((mean, std))
    mean_ref, std_ref = actor_forward_ref(state, params, ACTION_DIM)
    np.testing.assert_allclose(np.asarray(mean), np.asarray(mean_ref),
                               rtol=1e-5, atol=1e-5)
    np.testing.assert_allclose(np.asarray(std), np.asarray(std_ref),
                               rtol=1e-5, atol=1e-5)

    # Multi-tile case (2 grid steps, partial last tile) to exercise the batch grid.
    state2 = jax.random.normal(k_state2, (300, STATE_DIM), jnp.float32)
    mean2, std2 = actor_forward(state2, params, ACTION_DIM)
    jax.block_until_ready((mean2, std2))
    mean2_ref, std2_ref = actor_forward_ref(state2, params, ACTION_DIM)
    np.testing.assert_allclose(np.asarray(mean2), np.asarray(mean2_ref),
                               rtol=1e-5, atol=1e-5)
    np.testing.assert_allclose(np.asarray(std2), np.asarray(std2_ref),
                               rtol=1e-5, atol=1e-5)

    print("KERNEL_OK")
</pallas_src>

<mosaic_0001>
module attributes {stable_mosaic.version = 11 : i64} {
  func.func @actor_kernel(%arg0: i32, %arg1: memref<2x3xf32, #tpu.memory_space<vmem>>, %arg2: memref<3x32xf32, #tpu.memory_space<vmem>>, %arg3: memref<1x32xf32, #tpu.memory_space<vmem>>, %arg4: memref<32x32xf32, #tpu.memory_space<vmem>>, %arg5: memref<1x32xf32, #tpu.memory_space<vmem>>, %arg6: memref<8x32xf32, #tpu.memory_space<vmem>>, %arg7: memref<8x1xf32, #tpu.memory_space<vmem>>, %arg8: memref<8x2xf32, #tpu.memory_space<vmem>>) attributes {dimension_semantics = [#tpu.dimension_semantics<parallel>], iteration_bounds = array<i64: 1>, scalar_prefetch = 0 : i64, scratch_operands = 0 : i64, tpu.core_type = #tpu.core_type<tc>, window_params = [{transform_indices = @transform_0, window_bounds = array<i64: 2, 3>}, {pipeline_mode = #tpu.pipeline_mode<synchronous>, transform_indices = @transform_1, window_bounds = array<i64: 3, 32>}, {pipeline_mode = #tpu.pipeline_mode<synchronous>, transform_indices = @transform_2, window_bounds = array<i64: 1, 32>}, {pipeline_mode = #tpu.pipeline_mode<synchronous>, transform_indices = @transform_3, window_bounds = array<i64: 32, 32>}, {pipeline_mode = #tpu.pipeline_mode<synchronous>, transform_indices = @transform_4, window_bounds = array<i64: 1, 32>}, {pipeline_mode = #tpu.pipeline_mode<synchronous>, transform_indices = @transform_5, window_bounds = array<i64: 8, 32>}, {pipeline_mode = #tpu.pipeline_mode<synchronous>, transform_indices = @transform_6, window_bounds = array<i64: 8, 1>}, {transform_indices = @transform_7, window_bounds = array<i64: 8, 2>}]} {
    %c0 = arith.constant 0 : index
    %c0_0 = arith.constant 0 : index
    %0 = vector.load %arg1[%c0, %c0_0] : memref<2x3xf32, #tpu.memory_space<vmem>>, vector<2x3xf32>
    %c0_1 = arith.constant 0 : index
    %c0_2 = arith.constant 0 : index
    %1 = vector.load %arg2[%c0_1, %c0_2] : memref<3x32xf32, #tpu.memory_space<vmem>>, vector<3x32xf32>
    %cst = arith.constant dense<0.000000e+00> : vector<2x32xf32>
    %2 = tpu.matmul %0, %1, %cst {dimension_numbers = #tpu.dot_dimension_numbers<[1], [0], [0], [1], [0, 0, 1, 1], [], []>} : vector<2x3xf32>, vector<3x32xf32>, vector<2x32xf32> -> vector<2x32xf32>
    %c0_3 = arith.constant 0 : index
    %c0_4 = arith.constant 0 : index
    %3 = vector.load %arg3[%c0_3, %c0_4] : memref<1x32xf32, #tpu.memory_space<vmem>>, vector<1x32xf32>
    %4 = vector.broadcast %3 : vector<1x32xf32> to vector<2x32xf32>
    %5 = arith.addf %2, %4 : vector<2x32xf32>
    %cst_5 = arith.constant 0.000000e+00 : f32
    %6 = vector.broadcast %cst_5 : f32 to vector<2x32xf32>
    %7 = arith.maximumf %5, %6 : vector<2x32xf32>
    %c0_6 = arith.constant 0 : index
    %c0_7 = arith.constant 0 : index
    %8 = vector.load %arg4[%c0_6, %c0_7] : memref<32x32xf32, #tpu.memory_space<vmem>>, vector<32x32xf32>
    %cst_8 = arith.constant dense<0.000000e+00> : vector<2x32xf32>
    %9 = tpu.matmul %7, %8, %cst_8 {dimension_numbers = #tpu.dot_dimension_numbers<[1], [0], [0], [1], [0, 0, 1, 1], [], []>} : vector<2x32xf32>, vector<32x32xf32>, vector<2x32xf32> -> vector<2x32xf32>
    %c0_9 = arith.constant 0 : index
    %c0_10 = arith.constant 0 : index
    %10 = vector.load %arg5[%c0_9, %c0_10] : memref<1x32xf32, #tpu.memory_space<vmem>>, vector<1x32xf32>
    %11 = vector.broadcast %10 : vector<1x32xf32> to vector<2x32xf32>
    %12 = arith.addf %9, %11 : vector<2x32xf32>
    %cst_11 = arith.constant 0.000000e+00 : f32
    %13 = vector.broadcast %cst_11 : f32 to vector<2x32xf32>
    %14 = arith.maximumf %12, %13 : vector<2x32xf32>
    %c0_12 = arith.constant 0 : index
    %c0_13 = arith.constant 0 : index
    %15 = vector.load %arg6[%c0_12, %c0_13] : memref<8x32xf32, #tpu.memory_space<vmem>>, vector<8x32xf32>
    %cst_14 = arith.constant dense<0.000000e+00> : vector<8x2xf32>
    %16 = tpu.matmul %15, %14, %cst_14 {dimension_numbers = #tpu.dot_dimension_numbers<[1], [1], [0], [0], [0, 0, 1, 0], [], []>} : vector<8x32xf32>, vector<2x32xf32>, vector<8x2xf32> -> vector<8x2xf32>
    %c0_15 = arith.constant 0 : index
    %c0_16 = arith.constant 0 : index
    %17 = vector.load %arg7[%c0_15, %c0_16] : memref<8x1xf32, #tpu.memory_space<vmem>>, vector<8x1xf32>
    %18 = vector.broadcast %17 : vector<8x1xf32> to vector<8x2xf32>
    %19 = arith.addf %16, %18 : vector<8x2xf32>
    %20 = tpu.iota {dimensions = array<i32: 0>} : vector<8x2xi32>
    %cst_17 = arith.constant -1.000000e+02 : f32
    %cst_18 = arith.constant 1.000000e+02 : f32
    %21 = vector.broadcast %cst_17 : f32 to vector<8x2xf32>
    %22 = arith.maximumf %21, %19 : vector<8x2xf32>
    %23 = vector.broadcast %cst_18 : f32 to vector<8x2xf32>
    %24 = arith.minimumf %23, %22 : vector<8x2xf32>
    %cst_19 = arith.constant -2.000000e+01 : f32
    %cst_20 = arith.constant 2.000000e+00 : f32
    %25 = vector.broadcast %cst_19 : f32 to vector<8x2xf32>
    %26 = arith.maximumf %25, %19 : vector<8x2xf32>
    %27 = vector.broadcast %cst_20 : f32 to vector<8x2xf32>
    %28 = arith.minimumf %27, %26 : vector<8x2xf32>
    %29 = math.exp %28 : vector<8x2xf32>
    %cst_21 = arith.constant 0.00999999977 : f32
    %cst_22 = arith.constant 1.000000e+02 : f32
    %30 = vector.broadcast %cst_21 : f32 to vector<8x2xf32>
    %31 = arith.maximumf %30, %29 : vector<8x2xf32>
    %32 = vector.broadcast %cst_22 : f32 to vector<8x2xf32>
    %33 = arith.minimumf %32, %31 : vector<8x2xf32>
    %c1_i32 = arith.constant 1 : i32
    %34 = vector.broadcast %c1_i32 : i32 to vector<8x2xi32>
    %35 = arith.cmpi slt, %20, %34 : vector<8x2xi32>
    %36 = arith.select %35, %24, %33 : vector<8x2xi1>, vector<8x2xf32>
    %c0_23 = arith.constant 0 : index
    %c0_24 = arith.constant 0 : index
    %37 = vector.load %arg8[%c0_23, %c0_24] : memref<8x2xf32, #tpu.memory_space<vmem>>, vector<8x2xf32>
    tpu.vector_store %arg8[%c0_23, %c0_24], %36 {strides = array<i32>} : memref<8x2xf32, #tpu.memory_space<vmem>>, vector<8x2xf32>,
    return
  }
  func.func @transform_0(%arg0: i32) -> (i32, i32) {
    %c0_i32 = arith.constant 0 : i32
    %c0_i32_0 = arith.constant 0 : i32
    return %arg0, %c0_i32 : i32, i32
  }
  func.func @transform_1(%arg0: i32) -> (i32, i32) {
    %c0_i32 = arith.constant 0 : i32
    %c0_i32_0 = arith.constant 0 : i32
    %c0_i32_1 = arith.constant 0 : i32
    return %c0_i32, %c0_i32_0 : i32, i32
  }
  func.func @transform_2(%arg0: i32) -> (i32, i32) {
    %c0_i32 = arith.constant 0 : i32
    %c0_i32_0 = arith.constant 0 : i32
    %c0_i32_1 = arith.constant 0 : i32
    return %c0_i32, %c0_i32_0 : i32, i32
  }
  func.func @transform_3(%arg0: i32) -> (i32, i32) {
    %c0_i32 = arith.constant 0 : i32
    %c0_i32_0 = arith.constant 0 : i32
    %c0_i32_1 = arith.constant 0 : i32
    return %c0_i32, %c0_i32_0 : i32, i32
  }
  func.func @transform_4(%arg0: i32) -> (i32, i32) {
    %c0_i32 = arith.constant 0 : i32
    %c0_i32_0 = arith.constant 0 : i32
    %c0_i32_1 = arith.constant 0 : i32
    return %c0_i32, %c0_i32_0 : i32, i32
  }
  func.func @transform_5(%arg0: i32) -> (i32, i32) {
    %c0_i32 = arith.constant 0 : i32
    %c0_i32_0 = arith.constant 0 : i32
    %c0_i32_1 = arith.constant 0 : i32
    return %c0_i32, %c0_i32_0 : i32, i32
  }
  func.func @transform_6(%arg0: i32) -> (i32, i32) {
    %c0_i32 = arith.constant 0 : i32
    %c0_i32_0 = arith.constant 0 : i32
    %c0_i32_1 = arith.constant 0 : i32
    return %c0_i32, %c0_i32_0 : i32, i32
  }
  func.func @transform_7(%arg0: i32) -> (i32, i32) {
    %c0_i32 = arith.constant 0 : i32
    %c0_i32_0 = arith.constant 0 : i32
    return %c0_i32, %arg0 : i32, i32
  }
}

</mosaic_0001>

<bundles_post_ra>
// kernel: tpu_custom_call.1
= control target key start
LH: loop header
LB: loop body
LE: loop exit
PB: predicated region body
PF: predicated region fallthrough
CT: control target
= control target key end

     0   :  { %12 = vsyncpa [#allocation3], 0  ;;  %s385_s24 = smov [#allocation2]   ;;  %s455_s0 = inlined_call_operand.vmem [shape: f32[2,3], index: 0, kind: input, shape index: {}]   ;;  %s456_s1 = inlined_call_operand.vmem [shape: f32[3,32], index: 1, kind: input, shape index: {}]   ;;  %s457_s2 = inlined_call_operand.vmem [shape: f32[1,32], index: 2, kind: input, shape index: {}]   ;;  %s458_s3 = inlined_call_operand.hbm [shape: f32[32,32], index: 3, kind: input, shape index: {}]   ;;  %s459_s4 = inlined_call_operand.vmem [shape: f32[1,32], index: 4, kind: input, shape index: {}]   ;;  %s460_s5 = inlined_call_operand.vmem [shape: f32[8,32], index: 5, kind: input, shape index: {}]   ;;  %s461_s6 = inlined_call_operand.vmem [shape: f32[8,1], index: 6, kind: input, shape index: {}]   ;;  %s462_s7 = inlined_call_operand.vmem [shape: f32[8,2], index: 7, kind: output, shape index: {}]  }
   0x1   :  { %s24_s25 = sshll.u32 %s385_s24, 4  ;;  %s25_s25 = int_to_ptr.vmem [resolvable:$true] %s24_s25 }
   0x2   :  { %s371_s26 = scalar_lea.vmem %s25_s25, 512  ;;  %p376_p1 = scmp.lt.s32.totalorder %s25_s25, %s25_s25 }
   0x3   :  { %p372_p0 = scmp.ne.s32.totalorder %s25_s25, %s371_s26  ;;  %p377_p2 = scmp.lt.s32.totalorder %s371_s26, %s371_s26 }
   0x5   :  { %p378_p3 = por %p377_p2, %p376_p1 }
   0x7   :  { %p379_p4 = pnand %p378_p3, %p372_p0 }
   0x9   :  { %382 = shalt.err (!%p379_p4)
}
   0xa   :  { %s386_s27 = smov 128   ;;  %s387_s28 = smov 8  }
   0xb   :  { %30 = dma.hbm_to_vmem [thread:$0]  %s458_s3, 512, %s25_s25, [#allocation3], %s386_s27, %s386_s27, %s387_s28  }
   0xc   :  { %383 = dma.done.wait [#allocation3], 512  }
   0xd   :  { %384 = vsyncadd [#allocation3], 4294966784  ;;  %v388_v0 = vmov 0.0   ;;  %vm389_vm0 = vmmov 0   ;;  %vm53_vm1 = vcmask 1042432   ;;  %vm49_vm2 = vcmask 23552  }
   0xe   :  { %333 = vmatprep.subr.mxu0 %v388_v0  ;;  %335 = vmatprep.mubr.msk.f32.mxu0 %vm389_vm0, %v388_v0  ;;  %v41_v1 = vld [vmem:[%s456_s1] sm:$0x7]  ;;  %v131_v3 = vld [vmem:[#allocation2 + $0x18] sm:$0xff]  ;;  %v130_v4 = vld [vmem:[#allocation2 + $0x10] sm:$0xff]  ;;  %vm139_vm3 = vcmask 261120   ;;  %v390_v13 = vmov 0   ;;  %v297_v27 = vlaneseq }
   0xf   :  { %338 = vmatprep.subr.mxu1 %v388_v0  ;;  %346 = vmatprep.mubr.msk.f32.mxu1 %vm389_vm0, %v388_v0  ;;  %v40_v2 = vld [vmem:[%s455_s0] sm:$0x3]  ;;  %v129_v5 = vld [vmem:[#allocation2 + $0x8] sm:$0xff]  ;;  %vm309_vm5 = vcmask 15360  }
  0x10   :  { %334 = vmatpush3.msk.msra.mxu0 %vm53_vm1, %v41_v1  ;;  %339 = vmatpush3.msra.mxu1 %v131_v3  ;;  %v128_v6 = vld [vmem:[#allocation2] sm:$0xff]  ;;  %v298_v28 = vshrl.u32 %v297_v27, 7 }
  0x11   :  { %336 = vmatmul.mubr.msk.f32.vlgmr.msra.gmra.mxu0 %vm49_vm2, %v40_v2  ;;  %340 = vmatprep.subr.mxu1 %v388_v0  ;;  %v316_v7 = vld [vmem:[%s457_s2] ss:$0 sm:$0xff] }
  0x12   :  { %349 = vmatprep.subr.mxu0 %v388_v0  ;;  %351 = vmatprep.mubr.msk.f32.mxu0 %vm389_vm0, %v388_v0  ;;  %v215_v12 = vld [vmem:[%s461_s6] sm:$0xff]  ;;  %vm307_vm4 = vcmp.lt.s32.totalorder %v298_v28, 1 }
  0x13   :  { %341 = vmatpush3.msra.mxu1 %v130_v4  ;;  %360 = vset.pattern.permute.xlu0 %v390_v13  ;;  %v319_v14 = vld [vmem:[%s459_s4] ss:$0 sm:$0xff] }
  0x14   :  { %342 = vmatprep.subr.mxu1 %v388_v0  ;;  %218 = vperm.xlu0 %360, %v215_v12   ;;  %v214_v19 = vld [vmem:[%s460_s5] sm:$0xff] }
  0x15   :  { %343 = vmatpush3.msra.mxu1 %v129_v5 }
  0x16   :  { %344 = vmatprep.subr.mxu1 %v388_v0 }
  0x17   :  { %345 = vmatpush3.msra.mxu1 %v128_v6 }
  0x8f   :  { %v219_v20 = vpop.permute.xlu0 %218 }
  0xd1   :  { %v123_v8 = vpop.f32.mrf.mxu0 }
  0xd2   :  { %v124_v9 = vadd.f32 %v316_v7, %v123_v8 }
  0xd3   :  { %v337_v10 = vpop.f32.mrf.mxu0 }
  0xd4   :  { %v127_v11 = vmax.f32 %v124_v9, 0.0 }
  0xd6   :  { %347 = vmatmul.mubr.msk.f32.vlgmr.msra.gmra.mxu1 %vm139_vm3, %v127_v11 }
 0x196   :  { %v209_v15 = vpop.f32.mrf.mxu1 }
 0x197   :  { %v210_v16 = vadd.f32 %v319_v14, %v209_v15 }
 0x198   :  { %v348_v17 = vpop.f32.mrf.mxu1 }
 0x199   :  { %v213_v18 = vmax.f32 %v210_v16, 0.0 }
 0x19b   :  { %350 = vmatpush3.xpose.msk.msra.mxu0 %vm139_vm3, %v213_v18 }
 0x19e   :  { %352 = vmatmul.mubr.msk.f32.vlgmr.msra.gmra.mxu0 %vm139_vm3, %v214_v19 }
 0x25e   :  { %v293_v21 = vpop.f32.mrf.mxu0 }
 0x25f   :  { %v294_v22 = vadd.f32 %v293_v21, %v219_v20 }
 0x260   :  { %v353_v23 = vpop.f32.mrf.mxu0 }
 0x261   :  { %v301_v24 = vmax.f32 %v294_v22, -20.0  ;;  %v323_v31 = vclamps-f32 %v294_v22, 100.0 }
 0x263   :  { %v302_v25 = vmin.f32 %v301_v24, 2.0 }
 0x265   :  { %v303_v26 = vmul.f32 1.442695, %v302_v25 }
 0x267   :  { %361 = vpow2.f32 %v303_v26 }
 0x274   :  { %v362_v29 = vpop.eup %361 }
 0x275   :  { %v305_v30 = vmax.f32 %v362_v29, 0.01 }
 0x277   :  { %v306_v32 = vmin.f32 %v305_v30, 100.0 }
 0x279   :  { %v308_v33 = vsel %vm307_vm4, %v323_v31, %v306_v32 }
 0x27a   :  { %310 = vst.msk [vmem:[%s462_s7] sm:$0xff] %vm309_vm5, %v308_v33 }
 0x27b   :  { %315 = vsyncpa [#allocation3], 1 }

</bundles_post_ra>
